<compile_context>
chip_gen: v5e
topology: v5e:2x2
jax: 0.10.0
libtpu: 0.0.40
codegen_flags: <defaults>
</compile_context>

<pallas_src>
import jax
import jax.numpy as jnp
from jax import lax
from jax.experimental import pallas as pl
from jax.experimental.pallas import tpu as pltpu


def _round_up(x, m):
    return ((x + m - 1) // m) * m


def _tpu_profile():
    """Generation-specific tile sizes and VMEM budgets (see perf review)."""
    kind = ""
    try:
        kind = jax.devices()[0].device_kind.lower()
    except Exception:
        pass
    if "v5" in kind and ("lite" in kind or "v5e" in kind):
        # 16 MiB default scoped VMEM -> ~10 MiB double-buffered footprint, no override.
        return dict(tm=512, tn=1024, tk=1024, vmem_limit=None)
    if "v6" in kind:
        # Highest compute/BW ratio: needs the biggest tiles; ~28 MiB -> raise scoped limit.
        return dict(tm=1024, tn=2048, tk=1024, vmem_limit=64 * 1024 * 1024)
    if "v7" in kind:
        # Only 64 MiB physical VMEM per TC: stay well under with an explicit ~48 MiB cap.
        return dict(tm=1024, tn=2048, tk=1024, vmem_limit=48 * 1024 * 1024)
    # Conservative default that fits every generation's default scoped VMEM.
    return dict(tm=512, tn=1024, tk=1024, vmem_limit=None)


def _delta_linear_kernel(x_ref, w_ref, bias_ref, o_ref):
    # x_ref:    (tm, tk) bf16 input tile
    # w_ref:    (tk, tn) bf16 combined-weight tile, canonical (K, N) layout
    # bias_ref: (1, tn)  fp32 base-layer bias tile
    # o_ref:    (tm, tn) fp32 output tile, VMEM-resident across the K grid axis
    k = pl.program_id(2)

    @pl.when(k == 0)
    def _():
        o_ref[...] = jnp.zeros_like(o_ref)

    o_ref[...] += jnp.dot(x_ref[...], w_ref[...],
                          preferred_element_type=jnp.float32)

    @pl.when(k == pl.num_programs(2) - 1)
    def _():
        o_ref[...] += bias_ref[...]


def prepare_delta_linear4bit(w_base, w_delta, bias, scaling, *,
                             compute_dtype=jnp.bfloat16, profile=None):
    """One-time weight preparation, hoisted out of the per-call forward path.

    w_base / w_delta: torch-style (N, K).  Returns device-resident, pre-padded
    operands in the canonical (K, N) MXU layout plus the tile plan.
    """
    prof = profile or _tpu_profile()
    N, K = w_base.shape

    # Fold base + scaling*delta in fp32 (one bf16 rounding on the sum), transpose to
    # (K, N) so the kernel does a standard [tm,tk]x[tk,tn] dot with no layout change.
    w_comb = (jnp.asarray(w_base, jnp.float32)
              + float(scaling) * jnp.asarray(w_delta, jnp.float32)).T   # (K, N)

    tn = min(prof["tn"], _round_up(N, 128))
    tk = min(prof["tk"], _round_up(K, 128))
    K_pad = _round_up(K, tk)
    N_pad = _round_up(N, tn)

    w2d = jnp.pad(w_comb, ((0, K_pad - K), (0, N_pad - N))).astype(compute_dtype)
    b = jnp.zeros((N,), jnp.float32) if bias is None else jnp.asarray(bias, jnp.float32)
    b2d = jnp.pad(b, (0, N_pad - N)).reshape(1, N_pad)
    w2d = jax.block_until_ready(w2d)
    b2d = jax.block_until_ready(b2d)

    return dict(w=w2d, b=b2d, N=N, K=K, tn=tn, tk=tk,
                K_pad=K_pad, N_pad=N_pad, prof=prof, compute_dtype=compute_dtype)


def delta_linear4bit_forward(x, prep):
    """x: (..., K) -> (..., N) fp32.

    Computes base(x) + scaling*delta(x) (+ bias) as one fused matmul against the
    precombined, pre-padded weight from `prepare_delta_linear4bit`.
    """
    prof = prep["prof"]
    K, N = prep["K"], prep["N"]
    *lead, Kx = x.shape
    assert Kx == K, f"expected last dim {K}, got {Kx}"
    M = 1
    for d in lead:
        M *= d

    tn, tk = prep["tn"], prep["tk"]
    K_pad, N_pad = prep["K_pad"], prep["N_pad"]
    tm = min(prof["tm"], _round_up(max(M, 1), 16))   # bf16 sublane packing -> mult of 16
    M_pad = _round_up(M, tm)

    # Keep both TensorCores fed (megacore) when the parallel grid would be 1x1.
    while (M_pad // tm) * (N_pad // tn) < 2 and tn > 128 and tn % 256 == 0:
        tn //= 2

    x2d = jnp.pad(x.reshape(M, K),
                  ((0, M_pad - M), (0, K_pad - K))).astype(prep["compute_dtype"])

    grid = (M_pad // tm, N_pad // tn, K_pad // tk)

    cost = pl.CostEstimate(
        flops=2 * M_pad * N_pad * K_pad,
        transcendentals=0,
        bytes_accessed=(grid[1] * M_pad * K_pad * 2      # x, refetched per N block
                        + grid[0] * K_pad * N_pad * 2    # weight, refetched per M block
                        + N_pad * 4                      # bias
                        + M_pad * N_pad * 4))            # fp32 output

    out2d = pl.pallas_call(
        _delta_linear_kernel,
        out_shape=jax.ShapeDtypeStruct((M_pad, N_pad), jnp.float32),
        grid_spec=pltpu.PrefetchScalarGridSpec(
            num_scalar_prefetch=0,
            grid=grid,
            in_specs=[
                pl.BlockSpec((tm, tk), lambda i, j, k: (i, k)),   # x tile
                pl.BlockSpec((tk, tn), lambda i, j, k: (k, j)),   # combined weight tile
                pl.BlockSpec((1, tn), lambda i, j, k: (0, j)),    # bias tile
            ],
            out_specs=pl.BlockSpec((tm, tn), lambda i, j, k: (i, j)),
        ),
        compiler_params=pltpu.CompilerParams(
            dimension_semantics=("parallel", "parallel", "arbitrary"),
            vmem_limit_bytes=prof["vmem_limit"]),
        cost_estimate=cost,
    )(x2d, prep["w"], prep["b"])

    return out2d[:M, :N].reshape(*lead, N)


if __name__ == "__main__":
    # Small shapes consistent with a Linear adapter layer.
    B, S = 2, 8                 # batch, sequence
    in_features = 32
    out_features = 64
    r, delta_alpha = 8, 16
    scaling = delta_alpha / r   # 2.0 (use_rslora=False)

    key = jax.random.PRNGKey(0)
    kx, kwb, kb, kwd = jax.random.split(key, 4)

    x = jax.random.normal(kx, (B, S, in_features), dtype=jnp.float32)
    # torch-style Linear weights: (out_features, in_features)
    w_base = jax.random.normal(kwb, (out_features, in_features), jnp.float32) * 0.05
    bias = jax.random.normal(kb, (out_features,), jnp.float32) * 0.01
    w_delta = jax.random.normal(kwd, (out_features, in_features), jnp.float32) * 0.02

    prep = prepare_delta_linear4bit(w_base, w_delta, bias, scaling)
    out = delta_linear4bit_forward(x, prep)
    out = jax.block_until_ready(out)

    # Pure-JAX reference with matching bf16 rounding of the fused weight + fp32 accumulation.
    xe = x.astype(jnp.bfloat16).astype(jnp.float32)
    wce = ((w_base + scaling * w_delta).T.astype(jnp.bfloat16).astype(jnp.float32))  # (K, N)
    ref = jnp.einsum("bsk,kn->bsn", xe, wce,
                     precision=jax.lax.Precision.HIGHEST) + bias

    assert out.shape == (B, S, out_features)
    assert jnp.allclose(out, ref, atol=1e-2, rtol=1e-2)

    print("KERNEL_OK")
</pallas_src>

<mosaic_0001>
module attributes {stable_mosaic.version = 11 : i64} {
  func.func @_delta_linear_kernel(%arg0: i32, %arg1: i32, %arg2: i32, %arg3: memref<16x128xbf16, #tpu.memory_space<vmem>>, %arg4: memref<128x128xbf16, #tpu.memory_space<vmem>>, %arg5: memref<1x128xf32, #tpu.memory_space<vmem>>, %arg6: memref<16x128xf32, #tpu.memory_space<vmem>>) attributes {dimension_semantics = [#tpu.dimension_semantics<parallel>, #tpu.dimension_semantics<parallel>, #tpu.dimension_semantics<arbitrary>], iteration_bounds = array<i64: 1, 1, 1>, scalar_prefetch = 0 : i64, scratch_operands = 0 : i64, tpu.core_type = #tpu.core_type<tc>, window_params = [{transform_indices = @transform_0, window_bounds = array<i64: 16, 128>}, {transform_indices = @transform_1, window_bounds = array<i64: 128, 128>}, {transform_indices = @transform_2, window_bounds = array<i64: 1, 128>}, {transform_indices = @transform_3, window_bounds = array<i64: 16, 128>}]} {
    %c0_i32 = arith.constant 0 : i32
    %0 = arith.cmpi eq, %arg2, %c0_i32 : i32
    %1 = arith.extui %0 : i1 to i32
    %c0_i32_0 = arith.constant 0 : i32
    %2 = arith.cmpi ne, %1, %c0_i32_0 : i32
    scf.if %2 {
      %cst_10 = arith.constant 0.000000e+00 : f32
      %12 = vector.broadcast %cst_10 : f32 to vector<16x128xf32>
      %c0_11 = arith.constant 0 : index
      %c0_12 = arith.constant 0 : index
      %13 = vector.load %arg6[%c0_11, %c0_12] : memref<16x128xf32, #tpu.memory_space<vmem>>, vector<16x128xf32>
      tpu.vector_store %arg6[%c0_11, %c0_12], %12 {strides = array<i32>} : memref<16x128xf32, #tpu.memory_space<vmem>>, vector<16x128xf32>,
    } else {
    }
    %c0 = arith.constant 0 : index
    %c0_1 = arith.constant 0 : index
    %3 = vector.load %arg6[%c0, %c0_1] : memref<16x128xf32, #tpu.memory_space<vmem>>, vector<16x128xf32>
    %c0_2 = arith.constant 0 : index
    %c0_3 = arith.constant 0 : index
    %4 = vector.load %arg3[%c0_2, %c0_3] : memref<16x128xbf16, #tpu.memory_space<vmem>>, vector<16x128xbf16>
    %c0_4 = arith.constant 0 : index
    %c0_5 = arith.constant 0 : index
    %5 = vector.load %arg4[%c0_4, %c0_5] : memref<128x128xbf16, #tpu.memory_space<vmem>>, vector<128x128xbf16>
    %cst = arith.constant dense<0.000000e+00> : vector<16x128xf32>
    %6 = tpu.matmul %4, %5, %cst {dimension_numbers = #tpu.dot_dimension_numbers<[1], [0], [0], [1], [0, 0, 1, 1], [], []>} : vector<16x128xbf16>, vector<128x128xbf16>, vector<16x128xf32> -> vector<16x128xf32>
    %7 = arith.addf %3, %6 : vector<16x128xf32>
    %c0_6 = arith.constant 0 : index
    %c0_7 = arith.constant 0 : index
    %8 = vector.load %arg6[%c0_6, %c0_7] : memref<16x128xf32, #tpu.memory_space<vmem>>, vector<16x128xf32>
    tpu.vector_store %arg6[%c0_6, %c0_7], %7 {strides = array<i32>} : memref<16x128xf32, #tpu.memory_space<vmem>>, vector<16x128xf32>,
    %c0_i32_8 = arith.constant 0 : i32
    %9 = arith.cmpi eq, %arg2, %c0_i32_8 : i32
    %10 = arith.extui %9 : i1 to i32
    %c0_i32_9 = arith.constant 0 : i32
    %11 = arith.cmpi ne, %10, %c0_i32_9 : i32
    scf.if %11 {
      %c0_10 = arith.constant 0 : index
      %c0_11 = arith.constant 0 : index
      %12 = vector.load %arg6[%c0_10, %c0_11] : memref<16x128xf32, #tpu.memory_space<vmem>>, vector<16x128xf32>
      %c0_12 = arith.constant 0 : index
      %c0_13 = arith.constant 0 : index
      %13 = vector.load %arg5[%c0_12, %c0_13] : memref<1x128xf32, #tpu.memory_space<vmem>>, vector<1x128xf32>
      %14 = vector.broadcast %13 : vector<1x128xf32> to vector<16x128xf32>
      %15 = arith.addf %12, %14 : vector<16x128xf32>
      %c0_14 = arith.constant 0 : index
      %c0_15 = arith.constant 0 : index
      %16 = vector.load %arg6[%c0_14, %c0_15] : memref<16x128xf32, #tpu.memory_space<vmem>>, vector<16x128xf32>
      tpu.vector_store %arg6[%c0_14, %c0_15], %15 {strides = array<i32>} : memref<16x128xf32, #tpu.memory_space<vmem>>, vector<16x128xf32>,
    } else {
    }
    return
  }
  func.func @transform_0(%arg0: i32, %arg1: i32, %arg2: i32) -> (i32, i32) {
    %c0_i32 = arith.constant 0 : i32
    return %arg0, %arg2 : i32, i32
  }
  func.func @transform_1(%arg0: i32, %arg1: i32, %arg2: i32) -> (i32, i32) {
    %c0_i32 = arith.constant 0 : i32
    return %arg2, %arg1 : i32, i32
  }
  func.func @transform_2(%arg0: i32, %arg1: i32, %arg2: i32) -> (i32, i32) {
    %c0_i32 = arith.constant 0 : i32
    %c0_i32_0 = arith.constant 0 : i32
    return %c0_i32, %arg1 : i32, i32
  }
  func.func @transform_3(%arg0: i32, %arg1: i32, %arg2: i32) -> (i32, i32) {
    %c0_i32 = arith.constant 0 : i32
    return %arg0, %arg1 : i32, i32
  }
}

</mosaic_0001>

<bundles_post_ra>
// kernel: tpu_custom_call.1
= control target key start
LH: loop header
LB: loop body
LE: loop exit
PB: predicated region body
PF: predicated region fallthrough
CT: control target
= control target key end

     0   :  { %8 = vsyncpa [#allocation3], 0  ;;  %s349_s0 = inlined_call_operand.hbm [shape: bf16[16,128], index: 0, kind: input, shape index: {}]   ;;  %s350_s1 = inlined_call_operand.hbm [shape: bf16[128,128], index: 1, kind: input, shape index: {}]   ;;  %s351_s2 = inlined_call_operand.vmem [shape: f32[1,128], index: 2, kind: input, shape index: {}]   ;;  %s352_s3 = inlined_call_operand.hbm [shape: f32[16,128], index: 3, kind: output, shape index: {}]  }
   0x1   :  { %9 = vsyncpa [#allocation6], 0 }
   0x2   :  { %10 = vsyncpa [#allocation4], 0  ;;  %s15_s14 = sshll.u32 %s349_s0, 4  ;;  %s310_s15 = smov [#allocation2]   ;;  %s16_s14 = int_to_ptr.hbm [resolvable:$true] %s15_s14 }
   0x3   :  { %s17_s16 = sshll.u32 %s310_s15, 4  ;;  %s28_s19 = sshll.u32 %s350_s1, 4  ;;  %s18_s16 = int_to_ptr.vmem [resolvable:$true] %s17_s16  ;;  %s29_s19 = int_to_ptr.hbm [resolvable:$true] %s28_s19 }
   0x4   :  { %s311_s20 = smov 64   ;;  %s312_s21 = smov 4  }
   0x5   :  { %23 = dma.hbm_to_vmem [thread:$0]  %s16_s14, 128, %s18_s16, [#allocation3], %s311_s20, %s311_s20, %s312_s21  }
   0x6   :  { %s313_s22 = smov [#allocation5]  }
   0x7   :  { %s30_s23 = sshll.u32 %s313_s22, 4  ;;  %s31_s23 = int_to_ptr.vmem [resolvable:$true] %s30_s23 }
   0x8   :  { %36 = dma.hbm_to_vmem [thread:$0]  %s29_s19, 1024, %s31_s23, [#allocation6], %s311_s20, %s311_s20, %s312_s21  }
   0x9   :  { %304 = dma.done.wait [#allocation3], 128  }
   0xa   :  { %305 = vsyncadd [#allocation3], 4294967168 }
   0xb   :  { %306 = dma.done.wait [#allocation6], 1024  }
   0xc   :  { %307 = vsyncadd [#allocation6], 4294966272  ;;  %v222_v0 = vld [vmem:[#allocation5 + $0x38] sm:$0xff]  ;;  %v221_v1 = vld [vmem:[#allocation5 + $0x30] sm:$0xff]  ;;  %s314_s24 = smov [#allocation7]   ;;  %s164_s28 = sshll.u32 %s352_s3, 4  ;;  %s165_s28 = int_to_ptr.hbm [resolvable:$true] %s164_s28 }
   0xd   :  { %127 = vmatpush.bf16.msra.mxu0 %v222_v0  ;;  %v220_v2 = vld [vmem:[#allocation5 + $0x28] sm:$0xff]  ;;  %v219_v3 = vld [vmem:[#allocation5 + $0x20] sm:$0xff]  ;;  %v218_v4 = vld [vmem:[#allocation5 + $0x18] sm:$0xff]  ;;  %s162_s25 = sshll.u32 %s314_s24, 4  ;;  %s315_s29 = smov 128   ;;  %s163_s25 = int_to_ptr.vmem [resolvable:$true] %s162_s25 }
   0xe   :  { %v217_v5 = vld [vmem:[#allocation5 + $0x10] sm:$0xff]  ;;  %v216_v6 = vld [vmem:[#allocation5 + $0x8] sm:$0xff]  ;;  %v215_v7 = vld [vmem:[#allocation5] sm:$0xff]  ;;  %s316_s30 = smov 8  }
   0xf   :  { %v214_v8 = vld [vmem:[#allocation2] sm:$0xff] }
  0x10   :  { %v231_v9 = vld [vmem:[%s351_s2] ss:$0 sm:$0xff] }
  0x11   :  { %128 = vmatpush.bf16.msra.mxu0 %v221_v1 }
  0x15   :  { %129 = vmatpush.bf16.msra.mxu0 %v220_v2 }
  0x19   :  { %130 = vmatpush.bf16.msra.mxu0 %v219_v3 }
  0x1d   :  { %131 = vmatpush.bf16.msra.mxu0 %v218_v4 }
  0x21   :  { %132 = vmatpush.bf16.msra.mxu0 %v217_v5 }
  0x25   :  { %133 = vmatpush.bf16.msra.mxu0 %v216_v6 }
  0x29   :  { %134 = vmatpush.bf16.msra.mxu0 %v215_v7 }
  0x2c   :  { %135 = vmatmul.bf16.vlgmr.msra.gmra.mxu0 %v214_v8 }
  0xa9   :  { %v136_v10 = vpop.f32.mrf.mxu0 }
  0xaa   :  { %v154_v11 = vadd.f32 %v231_v9, %v136_v10 }
  0xac   :  { %156 = vst [vmem:[#allocation7] sm:$0xff] %v154_v11 }
  0xb1   :  { %v138_v12 = vpop.f32.mrf.mxu0 }
  0xb2   :  { %v155_v13 = vadd.f32 %v231_v9, %v138_v12 }
  0xb4   :  { %157 = vst [vmem:[#allocation7 + $0x8] sm:$0xff] %v155_v13 }
  0xb5   :  { %170 = dma.vmem_to_hbm [thread:$0]  %s163_s25, 256, %s165_s28, [#allocation4], %s315_s29, %s315_s29, %s316_s30  }
  0xb6   :  { %308 = dma.done.wait [#allocation4], 256  }
  0xb7   :  { %309 = vsyncadd [#allocation4], 4294967040 }
  0xb8   :  { %175 = vsyncpa [#allocation3], 1 }
  0xb9   :  { %176 = vsyncpa [#allocation6], 1 }
  0xba   :  { %177 = vsyncpa [#allocation4], 1 }

</bundles_post_ra>
